<compile_context>
chip_gen: v7x
topology: tpu7x:2x2x1
jax: 0.10.0
libtpu: 0.0.40
codegen_flags: <defaults>
</compile_context>

<pallas_src>
import functools

import jax
import jax.numpy as jnp
from jax.experimental import pallas as pl
from jax.experimental.pallas import tpu as pltpu

LANE = 128
SUBLANE = 8
QUANTUM = SUBLANE * LANE          # 1024 elements per (8, 128) group
MIB = 1 << 20


def _device_kind():
    try:
        return jax.devices()[0].device_kind.lower()
    except Exception:
        return ""


_IS_TPU7 = "7" in _device_kind()   # TPU7x: 3.2 TB/s HBM -> bigger per-step blocks

# Per-step HBM byte targets (review: 2-4 MiB on v5e/v6e, 4-8 MiB on v7x).
_P1_BLOCK_BYTES = (8 * MIB) if _IS_TPU7 else (4 * MIB)    # pass 1 streams input only
_P2_BLOCK_BYTES = (4 * MIB) if _IS_TPU7 else (2 * MIB)    # pass 2 streams in + out
# Fused single-kernel cutoff (f32-equivalent bytes of the whole tensor).
_FUSED_MAX_F32_BYTES = 2 * MIB
# Scoped-VMEM cap safe on every generation (v5e/v6e: 128 MiB phys, v7x: 64 MiB phys).
_VMEM_CAP = 48 * MIB


def _round_up(a, b):
    return ((a + b - 1) // b) * b


def _vmem_limit(nbytes):
    return int(min(_VMEM_CAP, max(32 * MIB, nbytes)))


# ------------------------------- kernels ----------------------------------- #

def _fused_kernel(x_ref, o_ref, *, qmax):
    """Whole-tensor fake quantize: min/max + scale/zp + quantize in one pass."""
    xf = x_ref[...].astype(jnp.float32)
    min_val = jnp.min(xf)
    max_val = jnp.max(xf)
    scale = (max_val - min_val) / qmax
    # Guard scale == 0 (constant tensor): PyTorch would raise on int(inf); emit a
    # finite result instead of NaNs.
    safe = jnp.where(scale > 0.0, scale, 1.0)
    inv_scale = 1.0 / safe
    izp = 0.0 - min_val * inv_scale
    # floor == int() truncation on the branch that survives the clamp (izp >= 0).
    zp = jnp.where(izp < 0.0, 0.0, jnp.where(izp > qmax, qmax, jnp.floor(izp)))
    q = jnp.round(jnp.clip(xf * inv_scale + zp, 0.0, qmax))
    # PyTorch's .byte() round-trip is an identity here (q integral in [0, qmax<=255]).
    o_ref[...] = (scale * (q - zp)).astype(o_ref.dtype)


def _minmax_kernel(x_ref, min_ref, max_ref, *, num_blocks, rem):
    """Accumulate element-wise (8,128) min/max partials across grid steps."""
    i = pl.program_id(0)

    @pl.when(i == 0)
    def _init():
        min_ref[...] = jnp.full_like(min_ref, jnp.inf)
        max_ref[...] = jnp.full_like(max_ref, -jnp.inf)

    def _fold(xv):
        xf = xv.astype(jnp.float32)        # bf16 upcast happens in-register
        # Element-wise fold down to one (8,128) partial (pure VPU); the expensive
        # cross-lane reduction to a scalar happens once, in the wrapper.
        min_ref[...] = jnp.minimum(min_ref[...], jnp.min(xf, axis=0))
        max_ref[...] = jnp.maximum(max_ref[...], jnp.max(xf, axis=0))

    if rem == 0:
        _fold(x_ref[...])
    else:
        # Only the final grid step hangs past the end of the array: slice the
        # statically-known valid prefix there, full-block fold everywhere else.
        @pl.when(i < num_blocks - 1)
        def _body():
            _fold(x_ref[...])

        @pl.when(i == num_blocks - 1)
        def _tail():
            _fold(x_ref[pl.ds(0, rem)])


def _fakequant_kernel(params_ref, x_ref, o_ref, *, qmax, num_blocks, rem):
    """q = round(clip(x * inv_scale + zp, 0, qmax)); out = scale * (q - zp)."""
    inv_scale = params_ref[0]
    zp = params_ref[1]
    scale = params_ref[2]

    def _quant(xv):
        xf = xv.astype(jnp.float32)
        # x * (1/scale) differs from x / scale by <= 1 ulp before rounding
        # (immaterial for fake quantization) and keeps the hot loop multiply-only.
        q = jnp.round(jnp.clip(xf * inv_scale + zp, 0.0, qmax))
        # PyTorch's .byte() cast is an identity (q integral in [0, qmax <= 255]).
        return (scale * (q - zp)).astype(o_ref.dtype)

    if rem == 0:
        o_ref[...] = _quant(x_ref[...])
    else:
        b = pl.program_id(0)

        @pl.when(b < num_blocks - 1)
        def _body():
            o_ref[...] = _quant(x_ref[...])

        @pl.when(b == num_blocks - 1)
        def _tail():
            o_ref[pl.ds(0, rem)] = _quant(x_ref[pl.ds(0, rem)])


# ------------------------------- wrapper ----------------------------------- #

def fake_quantize(x, num_bits=8):
    """Matches fake_quantize_fn(bit_list).forward(x) with num_bits=bit_list[-1]."""
    orig_shape = x.shape
    orig_dtype = x.dtype

    # Work natively for f32 / bf16 (upcast happens in-register inside the kernels);
    # anything else falls back to one f32 copy.
    if x.dtype == jnp.float32 or x.dtype == jnp.bfloat16:
        xw = x
    else:
        xw = x.astype(jnp.float32)
    itemsize = xw.dtype.itemsize

    n = xw.size
    padded_n = _round_up(n, QUANTUM)
    padded = padded_n != n
    flat = xw.reshape(-1)
    if padded:
        # TODO(synk): small edge-pad copy for sizes not divisible by 1024; padded
        # values duplicate real ones (min/max unaffected) and are sliced off after.
        flat = jnp.pad(flat, (0, padded_n - n), mode="edge")
    x3d = flat.reshape(-1, SUBLANE, LANE)
    g_total = x3d.shape[0]

    qmin = 0.0
    qmax = 2.0 ** num_bits - 1.0

    # ---------------- fused single-kernel path (small / medium tensors) -------
    f32_bytes_total = g_total * QUANTUM * 4
    if f32_bytes_total <= _FUSED_MAX_F32_BYTES:
        data_bytes = g_total * QUANTUM * itemsize
        out3d = pl.pallas_call(
            functools.partial(_fused_kernel, qmax=qmax),
            out_shape=jax.ShapeDtypeStruct(x3d.shape, x3d.dtype),
            in_specs=[pl.BlockSpec(memory_space=pltpu.MemorySpace.VMEM)],
            out_specs=pl.BlockSpec(memory_space=pltpu.MemorySpace.VMEM),
            compiler_params=pltpu.CompilerParams(
                vmem_limit_bytes=_vmem_limit(
                    4 * data_bytes + 6 * f32_bytes_total + 4 * MIB)),
            cost_estimate=pl.CostEstimate(
                flops=10 * n, transcendentals=0, bytes_accessed=2 * data_bytes),
        )(x3d)
        out = (out3d.reshape(-1)[:n].reshape(orig_shape) if padded
               else out3d.reshape(orig_shape))
        return out.astype(orig_dtype)

    # ---------------- two-pass streaming path (large tensors) -----------------
    # Pass 1: per-(8,128) element-wise min/max partials.  Block bytes stay at the
    # per-generation target regardless of dtype (bf16 doubles the group count).
    bg1 = max(1, min(_P1_BLOCK_BYTES // (QUANTUM * itemsize), g_total))
    nb1 = -(-g_total // bg1)
    rem1 = g_total % bg1
    blk1_in = bg1 * QUANTUM * itemsize
    blk1_f32 = bg1 * QUANTUM * 4

    min_p, max_p = pl.pallas_call(
        functools.partial(_minmax_kernel, num_blocks=nb1, rem=rem1),
        out_shape=(jax.ShapeDtypeStruct((SUBLANE, LANE), jnp.float32),
                   jax.ShapeDtypeStruct((SUBLANE, LANE), jnp.float32)),
        grid=(nb1,),
        in_specs=[pl.BlockSpec((bg1, SUBLANE, LANE), lambda i: (i, 0, 0))],
        out_specs=(pl.BlockSpec((SUBLANE, LANE), lambda i: (0, 0)),
                   pl.BlockSpec((SUBLANE, LANE), lambda i: (0, 0))),
        compiler_params=pltpu.CompilerParams(
            dimension_semantics=("arbitrary",),
            vmem_limit_bytes=_vmem_limit(2 * blk1_in + 2 * blk1_f32 + 4 * MIB)),
        cost_estimate=pl.CostEstimate(
            flops=2 * g_total * QUANTUM, transcendentals=0,
            bytes_accessed=g_total * QUANTUM * itemsize),
    )(x3d)

    # Tiny (8,128) cross-lane reductions + calcScaleZeroPoint scalar glue.
    min_val = jnp.min(min_p)
    max_val = jnp.max(max_p)
    scale = (max_val - min_val) / (qmax - qmin)
    # Guard scale == 0 (constant tensor): PyTorch would raise on int(inf) here.
    safe = jnp.where(scale > 0.0, scale, 1.0)
    inv_scale = 1.0 / safe
    izp = qmin - min_val * inv_scale
    zero_point = jnp.where(izp < qmin, qmin,
                           jnp.where(izp > qmax, qmax, jnp.floor(izp)))
    params = jnp.stack([inv_scale, zero_point, scale]).astype(jnp.float32)

    # Pass 2: elementwise fake quantize (read + write streams).
    bg2 = max(1, min(_P2_BLOCK_BYTES // (QUANTUM * itemsize), g_total))
    nb2 = -(-g_total // bg2)
    rem2 = g_total % bg2
    blk2_in = bg2 * QUANTUM * itemsize
    blk2_f32 = bg2 * QUANTUM * 4

    out3d = pl.pallas_call(
        functools.partial(_fakequant_kernel, qmax=qmax, num_blocks=nb2, rem=rem2),
        out_shape=jax.ShapeDtypeStruct((g_total, SUBLANE, LANE), x3d.dtype),
        grid=(nb2,),
        in_specs=[pl.BlockSpec(memory_space=pltpu.MemorySpace.SMEM),
                  pl.BlockSpec((bg2, SUBLANE, LANE), lambda b: (b, 0, 0))],
        out_specs=pl.BlockSpec((bg2, SUBLANE, LANE), lambda b: (b, 0, 0)),
        compiler_params=pltpu.CompilerParams(
            dimension_semantics=("parallel",),
            vmem_limit_bytes=_vmem_limit(4 * blk2_in + 4 * blk2_f32 + 4 * MIB)),
        cost_estimate=pl.CostEstimate(
            flops=8 * g_total * QUANTUM, transcendentals=0,
            bytes_accessed=2 * g_total * QUANTUM * itemsize),
    )(params, x3d)
    # TODO(synk): a CORE_PARALLEL leading axis (or pl.core_map over a 2-TC mesh) would
    # let both v7x TensorCores stream these passes; kept on the validated single-core
    # codegen path here.

    if padded:
        out = out3d.reshape(-1)[:n].reshape(orig_shape)
    else:
        out = out3d.reshape(orig_shape)
    return out.astype(orig_dtype)


class FakeQuantizeFn:
    """JAX analogue of fake_quantize_fn(nn.Module). No learnable params."""

    def __init__(self, bit_list):
        self.bit_list = bit_list
        self.wbit = bit_list[-1]
        self._fn = jax.jit(functools.partial(fake_quantize, num_bits=self.wbit))

    def __call__(self, x):
        return self._fn(x)


# ------------------------------- reference --------------------------------- #

def _reference(x, num_bits):
    x = x.astype(jnp.float32)
    min_val, max_val = jnp.min(x), jnp.max(x)
    qmin, qmax = 0.0, 2.0 ** num_bits - 1.0
    scale = (max_val - min_val) / (qmax - qmin)
    safe = jnp.where(scale > 0.0, scale, 1.0)
    inv_scale = 1.0 / safe
    izp = qmin - min_val * inv_scale
    zp = jnp.where(izp < qmin, qmin, jnp.where(izp > qmax, qmax, jnp.floor(izp)))
    # Mirror the kernel's x * (1/scale) (<= 1 ulp from x / scale before rounding).
    q = jnp.round(jnp.clip(x * inv_scale + zp, qmin, qmax))
    return scale * (q - zp)


if __name__ == "__main__":
    bit_list = [2, 4, 8]          # module config; wbit = bit_list[-1] = 8
    mod = FakeQuantizeFn(bit_list)
    key = jax.random.PRNGKey(0)

    # 1) module-sized activation (fused single-kernel path).
    x = jax.random.normal(key, (2, 4, 16, 16), dtype=jnp.float32)
    out = jax.block_until_ready(mod(x))
    ref = _reference(x, mod.wbit)
    assert out.shape == x.shape and out.dtype == x.dtype
    assert jnp.allclose(out, ref, atol=1e-5), "mismatch vs reference (fused)"

    # 2) ragged size: exercises the edge-pad fallback, still fused.
    x2 = jax.random.normal(jax.random.PRNGKey(0), (1, 8, 100, 200),
                           dtype=jnp.float32)
    out2 = jax.block_until_ready(mod(x2))
    ref2 = _reference(x2, mod.wbit)
    assert out2.shape == x2.shape and out2.dtype == x2.dtype
    assert jnp.allclose(out2, ref2, atol=1e-5), "mismatch vs reference (ragged)"

    # 3) larger f32 activation: two-pass streaming path with ragged trailing blocks.
    x3 = jax.random.normal(jax.random.PRNGKey(1), (8, 32, 65, 64),
                           dtype=jnp.float32)
    out3 = jax.block_until_ready(mod(x3))
    ref3 = _reference(x3, mod.wbit)
    assert out3.shape == x3.shape and out3.dtype == x3.dtype
    assert jnp.allclose(out3, ref3, atol=1e-5), "mismatch vs reference (two-pass)"

    # 4) bf16 two-pass path (doubled group tile keeps bytes/step constant).
    x4 = jax.random.normal(jax.random.PRNGKey(2), (8, 32, 64, 64),
                           dtype=jnp.bfloat16)
    out4 = jax.block_until_ready(mod(x4))
    ref4 = _reference(x4, mod.wbit)
    assert out4.shape == x4.shape and out4.dtype == jnp.bfloat16
    assert jnp.allclose(out4.astype(jnp.float32), ref4, atol=5e-2), \
        "mismatch vs reference (bf16 two-pass)"

    print("KERNEL_OK")
</pallas_src>

<mosaic_0001>
module attributes {stable_mosaic.version = 11 : i64} {
  func.func @_fused_kernel(%arg0: memref<2x8x128xf32, #tpu.memory_space<vmem>>, %arg1: memref<2x8x128xf32, #tpu.memory_space<vmem>>) attributes {dimension_semantics = [], scalar_prefetch = 0 : i64, scratch_operands = 0 : i64, tpu.core_type = #tpu.core_type<tc>} {
    %c0 = arith.constant 0 : index
    %c0_0 = arith.constant 0 : index
    %c0_1 = arith.constant 0 : index
    %0 = vector.load %arg0[%c0, %c0_0, %c0_1] : memref<2x8x128xf32, #tpu.memory_space<vmem>>, vector<2x8x128xf32>
    %1 = vector.shape_cast %0 : vector<2x8x128xf32> to vector<1x2x8x128xf32>
    %cst = arith.constant dense<0x7F800000> : vector<1xf32>
    %2 = vector.multi_reduction <minimumf>, %1, %cst [1, 2, 3] : vector<1x2x8x128xf32> to vector<1xf32>
    %3 = vector.shape_cast %2 : vector<1xf32> to vector<1x1x1x1xf32>
    %4 = vector.extract %3[0, 0, 0, 0] : f32 from vector<1x1x1x1xf32>
    %5 = vector.shape_cast %0 : vector<2x8x128xf32> to vector<1x2x8x128xf32>
    %cst_2 = arith.constant dense<0xFF800000> : vector<1xf32>
    %6 = vector.multi_reduction <maximumf>, %5, %cst_2 [1, 2, 3] : vector<1x2x8x128xf32> to vector<1xf32>
    %7 = vector.shape_cast %6 : vector<1xf32> to vector<1x1x1x1xf32>
    %8 = vector.extract %7[0, 0, 0, 0] : f32 from vector<1x1x1x1xf32>
    %9 = arith.subf %8, %4 : f32
    %cst_3 = arith.constant 2.550000e+02 : f32
    %10 = arith.divf %9, %cst_3 : f32
    %cst_4 = arith.constant 0.000000e+00 : f32
    %11 = arith.cmpf ogt, %10, %cst_4 : f32
    %cst_5 = arith.constant 1.000000e+00 : f32
    %12 = arith.select %11, %10, %cst_5 : f32
    %cst_6 = arith.constant 1.000000e+00 : f32
    %13 = arith.divf %cst_6, %12 : f32
    %14 = arith.mulf %4, %13 : f32
    %cst_7 = arith.constant 0.000000e+00 : f32
    %15 = arith.subf %cst_7, %14 : f32
    %cst_8 = arith.constant 0.000000e+00 : f32
    %16 = arith.cmpf olt, %15, %cst_8 : f32
    %cst_9 = arith.constant 2.550000e+02 : f32
    %17 = arith.cmpf ogt, %15, %cst_9 : f32
    %18 = math.floor %15 : f32
    %cst_10 = arith.constant 2.550000e+02 : f32
    %19 = arith.select %17, %cst_10, %18 : f32
    %cst_11 = arith.constant 0.000000e+00 : f32
    %20 = arith.select %16, %cst_11, %19 : f32
    %21 = vector.broadcast %13 : f32 to vector<2x8x128xf32>
    %22 = arith.mulf %0, %21 : vector<2x8x128xf32>
    %23 = vector.broadcast %20 : f32 to vector<2x8x128xf32>
    %24 = arith.addf %22, %23 : vector<2x8x128xf32>
    %cst_12 = arith.constant 0.000000e+00 : f32
    %cst_13 = arith.constant 2.550000e+02 : f32
    %25 = vector.broadcast %cst_12 : f32 to vector<2x8x128xf32>
    %26 = arith.maximumf %25, %24 : vector<2x8x128xf32>
    %27 = vector.broadcast %cst_13 : f32 to vector<2x8x128xf32>
    %28 = arith.minimumf %27, %26 : vector<2x8x128xf32>
    %29 = math.roundeven %28 : vector<2x8x128xf32>
    %30 = vector.broadcast %20 : f32 to vector<2x8x128xf32>
    %31 = arith.subf %29, %30 : vector<2x8x128xf32>
    %32 = vector.broadcast %10 : f32 to vector<2x8x128xf32>
    %33 = arith.mulf %32, %31 : vector<2x8x128xf32>
    %c0_14 = arith.constant 0 : index
    %c0_15 = arith.constant 0 : index
    %c0_16 = arith.constant 0 : index
    %34 = vector.load %arg1[%c0_14, %c0_15, %c0_16] : memref<2x8x128xf32, #tpu.memory_space<vmem>>, vector<2x8x128xf32>
    tpu.vector_store %arg1[%c0_14, %c0_15, %c0_16], %33 {strides = array<i32>} : memref<2x8x128xf32, #tpu.memory_space<vmem>>, vector<2x8x128xf32>,
    return
  }
}

</mosaic_0001>

<bundles_post_ra>
// kernel: fake_quantize.1
= control target key start
LH: loop header
LB: loop body
LE: loop exit
PB: predicated region body
PF: predicated region fallthrough
CT: control target
= control target key end

     0   :  { %s106_s0 = inlined_call_operand.vmem [shape: f32[2,8,128], index: 0, kind: input, shape index: {}]   ;;  %s107_s1 = inlined_call_operand.vmem [shape: f32[2,8,128], index: 1, kind: output, shape index: {}]  }
   0x1   :  { %v8_v0 = vld [vmem:[%s106_s0] sm:$0xff]  ;;  %v9_v1 = vld [vmem:[%s106_s0 + $0x8] sm:$0xff] }
   0x2   :  { %v10_v2 = vmin.f32 %v8_v0, %v9_v1  ;;  %v20_v3 = vmax.f32 %v8_v0, %v9_v1 }
   0x4   :  { %11 = vmin.xlane.f32.xlu0 %v10_v2 }
   0x8   :  { %21 = vmax.xlane.f32.xlu0 %v20_v3 }
  0x91   :  { %v12_v4 = vpop.xlane.xlu0 %11 }
  0x92   :  { %v13_v5 = vrot.slane %v12_v4, 4 }
  0x94   :  { %v14_v6 = vmin.f32 %v12_v4, %v13_v5 }
  0x95   :  { %v22_v7 = vpop.xlane.xlu0 %21 }
  0x96   :  { %v15_v8 = vrot.slane %v14_v6, 2  ;;  %v23_v9 = vrot.slane %v22_v7, 4 }
  0x98   :  { %v24_v10 = vmax.f32 %v22_v7, %v23_v9  ;;  %v16_v11 = vmin.f32 %v14_v6, %v15_v8 }
  0x9a   :  { %v25_v12 = vrot.slane %v24_v10, 2  ;;  %v17_v13 = vrot.slane %v16_v11, 1 }
  0x9c   :  { %v26_v14 = vmax.f32 %v24_v10, %v25_v12  ;;  %v18_v15 = vmin.f32 %v16_v11, %v17_v13 }
  0x9e   :  { %69 = vpush %v18_v15  ;;  %v27_v16 = vrot.slane %v26_v14, 1 }
  0xa0   :  { %v28_v17 = vmax.f32 %v26_v14, %v27_v16 }
  0xa2   :  { %71 = vpush %v28_v17 }
  0xcf   :  { %s70_s0 = spop %69 }
  0xd3   :  { %s72_s10 = spop %71 }
  0xd4   :  { %s30_s11 = ssub.f32 %s72_s10, %s70_s0 }
  0xd6   :  { %s95_s12 = smul.f32 0.003921569, %s30_s11 }
  0xd8   :  { %p34_p0 = scmp.gt.f32.partialorder %s95_s12, 0.0  ;;  %v60_v34 = vstv %s95_s12 }
  0xda   :  { %s35_s13 = scalar_select %p34_p0, %s95_s12, 1.0 }
  0xdc   :  { %v36_v18 = vstv %s35_s13 }
  0xdd   :  { %77 = vrcp.f32 %v36_v18 }
  0xe7   :  { %v78_v19 = vpop.eup %77 }
  0xe8   :  { %73 = vpush %v78_v19 }
 0x119   :  { %s74_s14 = spop %73 }
 0x11a   :  { %s39_s15 = smul.f32 %s74_s14, %s70_s0  ;;  %v46_v20 = vstv %s74_s14 }
 0x11b   :  { %v47_v21 = vmul.f32 %v46_v20, %v8_v0  ;;  %v48_v22 = vmul.f32 %v46_v20, %v9_v1 }
 0x11c   :  { %s40_s16 = ssub.f32 0.0, %s39_s15 }
 0x11e   :  { %p42_p1 = scmp.gt.f32.partialorder %s40_s16, 255.0  ;;  %p41_p2 = scmp.lt.f32.partialorder %s40_s16, 0.0 }
 0x11f   :  { %s43_s17 = sfloor.f32 %s40_s16 }
 0x120   :  { %s109_s17 = smov (%p42_p1, %s43_s17), 255.0 }
 0x121   :  { %s111_s17 = smov (%p41_p2, %s109_s17), 0.0 }
 0x122   :  { %v49_v23 = vstv %s111_s17 }
 0x123   :  { %v50_v24 = vadd.f32 %v49_v23, %v47_v21  ;;  %v51_v25 = vadd.f32 %v49_v23, %v48_v22 }
 0x125   :  { %v52_v26 = vmax.f32 %v50_v24, 0.0  ;;  %v53_v27 = vmax.f32 %v51_v25, 0.0 }
 0x127   :  { %v54_v28 = vmin.f32 %v52_v26, 255.0  ;;  %v55_v29 = vmin.f32 %v53_v27, 255.0 }
 0x129   :  { %v75_v30 = vround.rtne.f32 %v54_v28  ;;  %v76_v31 = vround.rtne.f32 %v55_v29 }
 0x12b   :  { %v58_v32 = vsub.f32 %v75_v30, %v49_v23  ;;  %v59_v33 = vsub.f32 %v76_v31, %v49_v23 }
 0x12d   :  { %v61_v35 = vmul.f32 %v60_v34, %v58_v32  ;;  %v62_v36 = vmul.f32 %v60_v34, %v59_v33 }
 0x12f   :  { %63 = vst [vmem:[%s107_s1] sm:$0xff] %v61_v35  ;;  %64 = vst [vmem:[%s107_s1 + $0x8] sm:$0xff] %v62_v36 }

</bundles_post_ra>
